<compile_context>
chip_gen: v7x
topology: tpu7x:2x2x1
jax: 0.10.0
libtpu: 0.0.40
codegen_flags: <defaults>
</compile_context>

<pallas_src>
import jax
import jax.numpy as jnp
from jax.experimental import pallas as pl
from jax.experimental.pallas import tpu as pltpu

_SUB = 8                  # f32 sublanes per vreg
_LANE = 128               # lanes per vreg
_DEFAULT_BLOCK_COLS = 16384   # (8, 16384) f32 = 512 KiB per block


def _round_up(x: int, m: int) -> int:
    return ((x + m - 1) // m) * m


def _lse_kernel(s_ref, o_ref, m_ref, l_ref):
    """Online logsumexp over one (8, block_cols) tile per grid step.

    s_ref : (8, block_cols) f32 VMEM   -- padded with -inf past the real data
    o_ref : (1, 1)          f32 VMEM   -- final logsumexp (written at last step)
    m_ref : (1, 1)          f32 VMEM scratch -- running max
    l_ref : (1, 1)          f32 VMEM scratch -- running sum(exp(. - m))
    """
    i = pl.program_id(0)

    @pl.when(i == 0)
    def _init():
        m_ref[...] = jnp.full_like(m_ref, -jnp.inf)
        l_ref[...] = jnp.zeros_like(l_ref)

    s = s_ref[...]                                             # (8, bn) f32

    m_prev = m_ref[...]                                        # (1, 1)
    m_blk = jnp.max(s, axis=(0, 1), keepdims=True)             # (1, 1)
    m_next = jnp.maximum(m_prev, m_blk)                        # (1, 1)

    # Rescale the running sum to the new max, add this block's contribution.
    # (exp(-inf - finite) = 0 at step 0; -inf padding contributes exp = 0.)
    alpha = jnp.exp(m_prev - m_next)                           # (1, 1)
    p_sum = jnp.sum(jnp.exp(s - m_next), axis=(0, 1), keepdims=True)
    l_ref[...] = alpha * l_ref[...] + p_sum
    m_ref[...] = m_next

    @pl.when(i == pl.num_programs(0) - 1)
    def _finalize():
        o_ref[...] = m_ref[...] + jnp.log(l_ref[...])


def contrastive_loss(scores: jax.Array,
                     max_block_cols: int = _DEFAULT_BLOCK_COLS) -> jax.Array:
    """scores: 1-D logits. Returns scalar loss = logsumexp(scores) - scores[0]."""
    assert scores.ndim == 1, "expected a 1-D list of scores"
    n = scores.shape[0]
    s = scores.astype(jnp.float32)

    # Pack into a sublane-dense (8, cols) slab, padded with -inf.
    max_block_cols = max(_LANE, _round_up(max_block_cols, _LANE))
    cols = max(_LANE, _round_up(-(-n // _SUB), _LANE))   # >= ceil(n/8), 128-aligned
    block_cols = min(max_block_cols, cols)
    cols = _round_up(cols, block_cols)                   # grid divides evenly
    n_pad = _SUB * cols

    s_pad = jnp.full((n_pad,), -jnp.inf, dtype=jnp.float32).at[:n].set(s)
    slab = s_pad.reshape(_SUB, cols)

    grid = (cols // block_cols,)

    lse = pl.pallas_call(
        _lse_kernel,
        out_shape=jax.ShapeDtypeStruct((1, 1), jnp.float32),
        grid_spec=pltpu.PrefetchScalarGridSpec(
            num_scalar_prefetch=0,
            grid=grid,
            in_specs=[pl.BlockSpec((_SUB, block_cols), lambda i: (0, i))],
            out_specs=pl.BlockSpec((1, 1), lambda i: (0, 0)),
            scratch_shapes=[pltpu.VMEM((1, 1), jnp.float32),   # running max
                            pltpu.VMEM((1, 1), jnp.float32)],  # running sumexp
        ),
        compiler_params=pltpu.CompilerParams(
            dimension_semantics=("arbitrary",)),
    )(slab)[0, 0]

    # `- scores[0]` as a host-side scalar op (free; avoids in-kernel lane extract).
    return lse - s[0]


if __name__ == "__main__":
    key = jax.random.PRNGKey(0)

    # Small shape consistent with the module: a vector of 8 scores.
    scores = jax.random.normal(key, (8,), dtype=jnp.float32)
    loss = jax.block_until_ready(contrastive_loss(scores))
    ref = jax.nn.logsumexp(scores) - scores[0]
    assert jnp.allclose(loss, ref, atol=1e-5, rtol=1e-5), (loss, ref)

    # Larger, non-multiple-of-block size (single big block, default tiling).
    key2 = jax.random.PRNGKey(1)
    scores_big = jax.random.normal(key2, (40000,), dtype=jnp.float32) * 3.0
    loss_big = jax.block_until_ready(contrastive_loss(scores_big))
    ref_big = jax.nn.logsumexp(scores_big) - scores_big[0]
    assert jnp.allclose(loss_big, ref_big, atol=1e-4, rtol=1e-5), (loss_big, ref_big)

    # Force a small block so the multi-step online-logsumexp grid path runs.
    loss_grid = jax.block_until_ready(
        contrastive_loss(scores_big, max_block_cols=512))
    assert jnp.allclose(loss_grid, ref_big, atol=1e-4, rtol=1e-5), (loss_grid, ref_big)

    print("KERNEL_OK")
</pallas_src>

<mosaic_0001>
module attributes {stable_mosaic.version = 11 : i64} {
  func.func @_lse_kernel(%arg0: i32, %arg1: memref<8x128xf32, #tpu.memory_space<vmem>>, %arg2: memref<1x1xf32, #tpu.memory_space<vmem>>, %arg3: memref<1x1xf32, #tpu.memory_space<vmem>>, %arg4: memref<1x1xf32, #tpu.memory_space<vmem>>) attributes {dimension_semantics = [#tpu.dimension_semantics<arbitrary>], iteration_bounds = array<i64: 1>, scalar_prefetch = 0 : i64, scratch_operands = 2 : i64, tpu.core_type = #tpu.core_type<tc>, window_params = [{transform_indices = @transform_0, window_bounds = array<i64: 8, 128>}, {pipeline_mode = #tpu.pipeline_mode<synchronous>, transform_indices = @transform_1, window_bounds = array<i64: 1, 1>}]} {
    %c0_i32 = arith.constant 0 : i32
    %0 = arith.cmpi eq, %arg0, %c0_i32 : i32
    %1 = arith.extui %0 : i1 to i32
    %c0_i32_0 = arith.constant 0 : i32
    %2 = arith.cmpi ne, %1, %c0_i32_0 : i32
    scf.if %2 {
      %cst_13 = arith.constant 0xFF800000 : f32
      %29 = vector.broadcast %cst_13 : f32 to vector<1x1xf32>
      %c0_14 = arith.constant 0 : index
      %c0_15 = arith.constant 0 : index
      %30 = vector.load %arg3[%c0_14, %c0_15] : memref<1x1xf32, #tpu.memory_space<vmem>>, vector<1x1xf32>
      tpu.vector_store %arg3[%c0_14, %c0_15], %29 {strides = array<i32>} : memref<1x1xf32, #tpu.memory_space<vmem>>, vector<1x1xf32>,
      %cst_16 = arith.constant 0.000000e+00 : f32
      %31 = vector.broadcast %cst_16 : f32 to vector<1x1xf32>
      %c0_17 = arith.constant 0 : index
      %c0_18 = arith.constant 0 : index
      %32 = vector.load %arg4[%c0_17, %c0_18] : memref<1x1xf32, #tpu.memory_space<vmem>>, vector<1x1xf32>
      tpu.vector_store %arg4[%c0_17, %c0_18], %31 {strides = array<i32>} : memref<1x1xf32, #tpu.memory_space<vmem>>, vector<1x1xf32>,
    } else {
    }
    %c0 = arith.constant 0 : index
    %c0_1 = arith.constant 0 : index
    %3 = vector.load %arg1[%c0, %c0_1] : memref<8x128xf32, #tpu.memory_space<vmem>>, vector<8x128xf32>
    %c0_2 = arith.constant 0 : index
    %c0_3 = arith.constant 0 : index
    %4 = vector.load %arg3[%c0_2, %c0_3] : memref<1x1xf32, #tpu.memory_space<vmem>>, vector<1x1xf32>
    %5 = vector.shape_cast %3 : vector<8x128xf32> to vector<1x8x128xf32>
    %cst = arith.constant dense<0xFF800000> : vector<1xf32>
    %6 = vector.multi_reduction <maximumf>, %5, %cst [1, 2] : vector<1x8x128xf32> to vector<1xf32>
    %7 = vector.shape_cast %6 : vector<1xf32> to vector<1x1x1xf32>
    %8 = vector.extract %7[0, 0, 0] : f32 from vector<1x1x1xf32>
    %9 = vector.broadcast %8 : f32 to vector<1x1xf32>
    %10 = arith.maximumf %4, %9 : vector<1x1xf32>
    %11 = arith.subf %4, %10 : vector<1x1xf32>
    %12 = math.exp %11 : vector<1x1xf32>
    %13 = vector.broadcast %10 : vector<1x1xf32> to vector<8x128xf32>
    %14 = arith.subf %3, %13 : vector<8x128xf32>
    %15 = math.exp %14 : vector<8x128xf32>
    %16 = vector.shape_cast %15 : vector<8x128xf32> to vector<1x8x128xf32>
    %cst_4 = arith.constant dense<0.000000e+00> : vector<1xf32>
    %17 = vector.multi_reduction <add>, %16, %cst_4 [1, 2] : vector<1x8x128xf32> to vector<1xf32>
    %18 = vector.shape_cast %17 : vector<1xf32> to vector<1x1x1xf32>
    %19 = vector.extract %18[0, 0, 0] : f32 from vector<1x1x1xf32>
    %20 = vector.broadcast %19 : f32 to vector<1x1xf32>
    %c0_5 = arith.constant 0 : index
    %c0_6 = arith.constant 0 : index
    %21 = vector.load %arg4[%c0_5, %c0_6] : memref<1x1xf32, #tpu.memory_space<vmem>>, vector<1x1xf32>
    %22 = arith.mulf %12, %21 : vector<1x1xf32>
    %23 = arith.addf %22, %20 : vector<1x1xf32>
    %c0_7 = arith.constant 0 : index
    %c0_8 = arith.constant 0 : index
    %24 = vector.load %arg4[%c0_7, %c0_8] : memref<1x1xf32, #tpu.memory_space<vmem>>, vector<1x1xf32>
    tpu.vector_store %arg4[%c0_7, %c0_8], %23 {strides = array<i32>} : memref<1x1xf32, #tpu.memory_space<vmem>>, vector<1x1xf32>,
    %c0_9 = arith.constant 0 : index
    %c0_10 = arith.constant 0 : index
    %25 = vector.load %arg3[%c0_9, %c0_10] : memref<1x1xf32, #tpu.memory_space<vmem>>, vector<1x1xf32>
    tpu.vector_store %arg3[%c0_9, %c0_10], %10 {strides = array<i32>} : memref<1x1xf32, #tpu.memory_space<vmem>>, vector<1x1xf32>,
    %c0_i32_11 = arith.constant 0 : i32
    %26 = arith.cmpi eq, %arg0, %c0_i32_11 : i32
    %27 = arith.extui %26 : i1 to i32
    %c0_i32_12 = arith.constant 0 : i32
    %28 = arith.cmpi ne, %27, %c0_i32_12 : i32
    scf.if %28 {
      %c0_13 = arith.constant 0 : index
      %c0_14 = arith.constant 0 : index
      %29 = vector.load %arg3[%c0_13, %c0_14] : memref<1x1xf32, #tpu.memory_space<vmem>>, vector<1x1xf32>
      %c0_15 = arith.constant 0 : index
      %c0_16 = arith.constant 0 : index
      %30 = vector.load %arg4[%c0_15, %c0_16] : memref<1x1xf32, #tpu.memory_space<vmem>>, vector<1x1xf32>
      %31 = math.log %30 : vector<1x1xf32>
      %32 = arith.addf %29, %31 : vector<1x1xf32>
      %c0_17 = arith.constant 0 : index
      %c0_18 = arith.constant 0 : index
      %33 = vector.load %arg2[%c0_17, %c0_18] : memref<1x1xf32, #tpu.memory_space<vmem>>, vector<1x1xf32>
      tpu.vector_store %arg2[%c0_17, %c0_18], %32 {strides = array<i32>} : memref<1x1xf32, #tpu.memory_space<vmem>>, vector<1x1xf32>,
    } else {
    }
    return
  }
  func.func @transform_0(%arg0: i32) -> (i32, i32) {
    %c0_i32 = arith.constant 0 : i32
    %c0_i32_0 = arith.constant 0 : i32
    return %c0_i32, %arg0 : i32, i32
  }
  func.func @transform_1(%arg0: i32) -> (i32, i32) {
    %c0_i32 = arith.constant 0 : i32
    %c0_i32_0 = arith.constant 0 : i32
    %c0_i32_1 = arith.constant 0 : i32
    return %c0_i32, %c0_i32_0 : i32, i32
  }
}

</mosaic_0001>

<bundles_post_ra>
// kernel: tpu_custom_call.1
= control target key start
LH: loop header
LB: loop body
LE: loop exit
PB: predicated region body
PF: predicated region fallthrough
CT: control target
= control target key end

     0   :  { %6 = vsyncpa [#allocation5], 0  ;;  %s204_s0 = inlined_call_operand.hbm [shape: f32[8,128], index: 0, kind: input, shape index: {}]   ;;  %s205_s1 = inlined_call_operand.hbm [shape: f32[1,1], index: 1, kind: output, shape index: {}]  }
   0x1   :  { %7 = vsyncpa [#allocation6], 0  ;;  %s160_s6 = smov [#allocation4]   ;;  %s112_s10 = scalar_lea.hbm %s204_s0, 128 }
   0x2   :  { %s14_s7 = sshll.u32 %s160_s6, 4  ;;  %p113_p0 = scmp.ne.s32.totalorder %s204_s0, %s112_s10  ;;  %s15_s7 = int_to_ptr.vmem [resolvable:$true] %s14_s7 }
   0x3   :  { %p116_p1 = scmp.lt.u32.totalorder %s112_s10, %s204_s0 }
   0x5   :  { %p118_p2 = pnand %p116_p1, %p113_p0 }
   0x7   :  { %121 = shalt.err (!%p118_p2)
}
   0x8   :  { %s122_s15 = scalar_lea.vmem %s15_s7, 128  ;;  %p127_p4 = scmp.lt.s32.totalorder %s15_s7, %s15_s7 }
   0x9   :  { %p123_p3 = scmp.ne.s32.totalorder %s15_s7, %s122_s15  ;;  %p128_p5 = scmp.lt.s32.totalorder %s122_s15, %s122_s15 }
   0xb   :  { %p129_p6 = por %p128_p5, %p127_p4 }
   0xd   :  { %p130_p7 = pnand %p129_p6, %p123_p3 }
   0xf   :  { %133 = shalt.err (!%p130_p7)
}
  0x10   :  { %17 = dma.hbm_to_vmem [thread:$0]  %s204_s0, 128, %s15_s7, [#allocation5]  }
  0x11   :  { %156 = dma.done.wait [#allocation5], 128  }
  0x12   :  { %157 = vsyncadd [#allocation5], 4294967168  ;;  %v28_v0 = vld [vmem:[#allocation4] sm:$0xff]  ;;  %vm25_vm0 = vcmask 0   ;;  %v161_v1 = vmov -inf   ;;  %v162_v2 = vmov 0   ;;  %v45_v11 = vlaneseq }
  0x13   :  { %30 = vmax.xlane.f32.xlu0 %v28_v0  ;;  %26 = vst.msk [vmem:[#allocation2] sm:$0x1] %vm25_vm0, %v161_v1  ;;  %v163_v3 = vmov 0.0   ;;  %s164_s19 = smov [#allocation7]  }
  0x14   :  { %105 = vset.pattern.permute.xlu0 %v162_v2  ;;  %27 = vst.msk [vmem:[#allocation3] sm:$0x1] %vm25_vm0, %v163_v3  ;;  %v46_v12 = vshrl.u32 %v45_v11, 7  ;;  %s87_s20 = sshll.u32 %s164_s19, 4  ;;  %s88_s20 = int_to_ptr.vmem [resolvable:$true] %s87_s20 }
  0x15   :  { %s134_s21 = scalar_lea.vmem %s88_s20, 16  ;;  %s138_s22 = scalar_lea.vmem %s88_s20, 32 }
  0x16   :  { %v47_v14 = vsub.s32 0, %v46_v12  ;;  %p135_p8 = scmp.ne.s32.totalorder %s88_s20, %s134_s21  ;;  %p139_p9 = scmp.lt.s32.totalorder %s88_s20, %s88_s20 }
  0x17   :  { %p140_p10 = scmp.lt.s32.totalorder %s138_s22, %s134_s21 }
  0x19   :  { %p141_p11 = por %p140_p10, %p139_p9 }
  0x1a   :  { %v29_v13 = vld [vmem:[#allocation2] sm:$0x1] }
  0x1b   :  { %v66_v32 = vld [vmem:[#allocation3] sm:$0x1]  ;;  %p142_p12 = pnand %p141_p11, %p135_p8 }
  0xa0   :  { %v31_v4 = vpop.xlane.xlu0 %30 }
  0xa1   :  { %v32_v5 = vrot.slane %v31_v4, 4 }
  0xa3   :  { %v33_v6 = vmax.f32 %v31_v4, %v32_v5 }
  0xa5   :  { %v34_v7 = vrot.slane %v33_v6, 2 }
  0xa7   :  { %v35_v8 = vmax.f32 %v33_v6, %v34_v7 }
  0xa9   :  { %v36_v9 = vrot.slane %v35_v8, 1 }
  0xab   :  { %v37_v10 = vmax.f32 %v35_v8, %v36_v9 }
  0xad   :  { %96 = vpush %v37_v10 }
  0xde   :  { %s97_s0 = spop %96 }
  0xdf   :  { %v39_v15 = vstv %s97_s0 }
  0xe0   :  { %v40_v16 = vmax.f32 %v29_v13, %v39_v15 }
  0xe2   :  { %v41_v17 = vsub.f32 %v29_v13, %v40_v16  ;;  %71 = vst.msk [vmem:[#allocation2] sm:$0x1] %vm25_vm0, %v40_v16  ;;  %v48_v18 = vrot.slane %v40_v16, %v47_v14 }
  0xe4   :  { %50 = vperm.xlu0 %105, %v48_v18   ;;  %v42_v30 = vmul.f32 1.442695, %v41_v17 }
  0xe9   :  { %v75_v39 = vld [vmem:[#allocation2] sm:$0x1] }
 0x163   :  { %v51_v19 = vpop.permute.xlu0 %50 }
 0x164   :  { %v53_v20 = vsub.f32 %v28_v0, %v51_v19 }
 0x166   :  { %v54_v21 = vmul.f32 1.442695, %v53_v20 }
 0x168   :  { %106 = vpow2.f32 %v54_v21 }
 0x169   :  { %108 = vpow2.f32 %v42_v30 }
 0x172   :  { %v107_v22 = vpop.eup %106 }
 0x173   :  { %56 = vadd.xlane.f32.xlu1 %v107_v22  ;;  %v109_v31 = vpop.eup %108 }
 0x174   :  { %v67_v33 = vmul.f32 %v109_v31, %v66_v32 }
 0x200   :  { %v57_v23 = vpop.xlane.xlu1 %56 }
 0x201   :  { %v58_v24 = vrot.slane %v57_v23, 4 }
 0x203   :  { %v59_v25 = vadd.f32 %v58_v24, %v57_v23 }
 0x205   :  { %v60_v26 = vrot.slane %v59_v25, 2 }
 0x207   :  { %v61_v27 = vadd.f32 %v60_v26, %v59_v25 }
 0x209   :  { %v62_v28 = vrot.slane %v61_v27, 1 }
 0x20b   :  { %v63_v29 = vadd.f32 %v62_v28, %v61_v27 }
 0x20d   :  { %98 = vpush %v63_v29 }
 0x23e   :  { %s99_s18 = spop %98 }
 0x23f   :  { %v65_v34 = vstv %s99_s18 }
 0x240   :  { %v68_v35 = vadd.f32 %v67_v33, %v65_v34 }
 0x242   :  { %70 = vst.msk [vmem:[#allocation3] sm:$0x1] %vm25_vm0, %v68_v35 }
 0x249   :  { %v76_v36 = vld [vmem:[#allocation3] sm:$0x1] }
 0x24a   :  { %110 = vlog2.f32 %v76_v36 }
 0x254   :  { %v111_v37 = vpop.eup %110 }
 0x255   :  { %v78_v38 = vmul.f32 0.6931472, %v111_v37 }
 0x257   :  { %v79_v40 = vadd.f32 %v78_v38, %v75_v39 }
 0x259   :  { %80 = vst.msk [vmem:[#allocation7] sm:$0x1] %vm25_vm0, %v79_v40 }
 0x25a   :  { %145 = shalt.err (!%p142_p12)
}
 0x25b   :  { %s146_s25 = scalar_lea.hbm %s205_s1, 16 }
 0x25c   :  { %p147_p13 = scmp.ne.s32.totalorder %s205_s1, %s146_s25  ;;  %p150_p0 = scmp.lt.u32.totalorder %s146_s25, %s205_s1 }
 0x25e   :  { %p152_p1 = pnand %p150_p0, %p147_p13 }
 0x260   :  { %155 = shalt.err (!%p152_p1)
}
 0x261   :  { %90 = dma.vmem_to_hbm [thread:$0]  %s88_s20, 16, %s205_s1, [#allocation6]  }
 0x262   :  { %158 = dma.done.wait [#allocation6], 16  }
 0x263   :  { %159 = vsyncadd [#allocation6], 4294967280 }
 0x264   :  { %94 = vsyncpa [#allocation5], 1 }
 0x265   :  { %95 = vsyncpa [#allocation6], 1 }

</bundles_post_ra>
